<compile_context>
chip_gen: v6e
topology: v6e:2x2x1
jax: 0.10.0
libtpu: 0.0.40
codegen_flags: <defaults>
</compile_context>

<pallas_src>
import jax
import jax.numpy as jnp
from jax.experimental import pallas as pl
from jax.experimental.pallas import tpu as pltpu


def audio_encoder_kernel(x_ref, w1_ref, s1_ref, sh1_ref,
                         w2_ref, s2_ref, sh2_ref,
                         wp_ref, bp_ref, o_ref, y1_scr):
    Bt, L, Cin = x_ref.shape          # Cin = 64
    L1 = L - 2                        # after Conv1d(64->64, k=3)
    Lp = L1 // 2                      # after MaxPool1d(2)
    L2 = Lp - 2                       # after Conv1d(64->128, k=3)

    # ---- Conv1d(64 -> 64, k=3): one batched im2col matmul, K padded to 256 ----
    x0 = x_ref[:, 0:L1, :]
    x1 = x_ref[:, 1:L1 + 1, :]
    x2 = x_ref[:, 2:L1 + 2, :]
    zpad = jnp.zeros((Bt, L1, Cin), jnp.float32)
    xcat = jnp.concatenate([x0, x1, x2, zpad], axis=-1)            # (Bt, L1, 256)
    xcat = xcat.reshape(Bt * L1, 4 * Cin).astype(jnp.bfloat16)     # lane-dense slab
    h1 = jnp.dot(xcat, w1_ref[...],
                 preferred_element_type=jnp.float32)               # (Bt*L1, 128)

    # ---- BatchNorm1d(64) (eval, conv bias folded) + ReLU (padded channels -> 0) ----
    y1 = jnp.maximum(h1 * s1_ref[...] + sh1_ref[...], 0.0)         # (Bt*L1, 128) f32

    # ---- MaxPool1d(2): one scratch store + two strided sublane reads ----
    y1_scr[...] = y1
    if L1 % 2 == 0:
        even = y1_scr[pl.ds(0, Bt * Lp, stride=2), :]              # (Bt*Lp, 128)
        odd = y1_scr[pl.ds(1, Bt * Lp, stride=2), :]
        y1p = jnp.maximum(even, odd)
    else:
        # TODO(synk): odd conv1 length (rare); per-batch strided reads, loads only.
        parts = []
        for b in range(Bt):
            e = y1_scr[pl.ds(b * L1, Lp, stride=2), :]
            o = y1_scr[pl.ds(b * L1 + 1, Lp, stride=2), :]
            parts.append(jnp.maximum(e, o))
        y1p = jnp.concatenate(parts, axis=0)
    y1p = y1p.reshape(Bt, Lp, 128)                                 # lane-dense split

    # ---- Conv1d(64 -> 128, k=3): one batched im2col matmul, K = 3*128 ----
    xcat2 = jnp.concatenate(
        [y1p[:, 0:L2, :], y1p[:, 1:L2 + 1, :], y1p[:, 2:L2 + 2, :]],
        axis=-1)                                                    # (Bt, L2, 384)
    xcat2 = xcat2.reshape(Bt * L2, 3 * 128).astype(jnp.bfloat16)
    h2 = jnp.dot(xcat2, w2_ref[...],
                 preferred_element_type=jnp.float32)                # (Bt*L2, 128)

    # ---- BatchNorm (eval, folded; includes 1/L2 of the avg-pool) + ReLU ----
    y2 = jnp.maximum(h2 * s2_ref[...] + sh2_ref[...], 0.0)          # (Bt*L2, 128)

    # ---- AdaptiveAvgPool1d(1): pure sum (1/L2 already folded into BN2) ----
    feats = jnp.sum(y2.reshape(Bt, L2, 128), axis=1)                # (Bt, 128)

    # ---- projection: Linear(128,128) + ReLU (Dropout = identity at inference) ----
    proj = jnp.dot(feats.astype(jnp.bfloat16), wp_ref[...],
                   preferred_element_type=jnp.float32) + bp_ref[...]
    o_ref[...] = jnp.maximum(proj, 0.0).reshape(1, Bt, 128)         # lane-dense


def _pick_batch_tile(B, L, requested):
    """Size the batch tile from a rough VMEM working-set estimate."""
    L1 = max(L - 2, 1)
    per_elem = (2 * L * 64 * 4        # double-buffered f32 input tile
                + L1 * 128 * 4        # f32 pooling scratch
                + L1 * 256 * 2        # bf16 conv1 im2col slab
                + 2 * L1 * 128 * 4)   # f32 conv1 activations (pre/post BN)
    budget = 8 * 1024 * 1024          # stay well under the 32 MiB scoped limit (v7x: 64 MiB phys)
    bt = max(1, min(requested, budget // max(per_elem, 1)))
    if B > 1:
        bt = min(bt, -(-B // 2))      # v7x: keep >= 2 parallel grid steps (2 TensorCores)
    return max(1, min(bt, B))


def audio_encoder(audio_features, kparams, *, batch_tile=8):
    # audio_features: (B, 1, 64, L) -> squeeze(1) -> (B, 64, L) -> (B, L, 64)
    x = jnp.squeeze(audio_features, axis=1).astype(jnp.float32)
    B, C, L = x.shape
    L1 = L - 2
    Lp = L1 // 2
    L2 = Lp - 2
    assert C == 64 and L2 >= 1

    x = jnp.transpose(x, (0, 2, 1))                 # (B, L, 64): time on sublanes

    Bt = _pick_batch_tile(B, L, batch_tile)
    G = -(-B // Bt)                                 # grid steps
    Bp = G * Bt
    if Bp != B:
        x = jnp.pad(x, ((0, Bp - B), (0, 0), (0, 0)))

    # Fold AdaptiveAvgPool1d(1)'s 1/L2 into BN2 scale/shift (ReLU is pos. homogeneous).
    s2 = kparams["s2"] * (1.0 / L2)
    sh2 = kparams["sh2"] * (1.0 / L2)

    # NOTE: x BlockSpec left at default double-buffering; bump to
    # pipeline_mode=pl.Buffered(3) only if a trace shows exposed input DMA.
    out = pl.pallas_call(
        audio_encoder_kernel,
        grid=(G,),
        in_specs=[
            pl.BlockSpec((Bt, L, 64), lambda i: (i, 0, 0)),    # input tile
            pl.BlockSpec((256, 128), lambda i: (0, 0)),        # conv1 fused W (padded)
            pl.BlockSpec((1, 128), lambda i: (0, 0)),          # bn1 scale (lane-major)
            pl.BlockSpec((1, 128), lambda i: (0, 0)),          # bn1 shift
            pl.BlockSpec((384, 128), lambda i: (0, 0)),        # conv2 fused W (padded)
            pl.BlockSpec((1, 128), lambda i: (0, 0)),          # bn2 scale (incl. 1/L2)
            pl.BlockSpec((1, 128), lambda i: (0, 0)),          # bn2 shift (incl. 1/L2)
            pl.BlockSpec((128, 128), lambda i: (0, 0)),        # projection W^T
            pl.BlockSpec((1, 128), lambda i: (0, 0)),          # projection bias
        ],
        out_specs=pl.BlockSpec((1, Bt, 128), lambda i: (i, 0, 0)),
        out_shape=jax.ShapeDtypeStruct((G, Bt, 128), jnp.float32),
        scratch_shapes=[pltpu.VMEM((Bt * L1, 128), jnp.float32)],  # maxpool staging
        compiler_params=pltpu.CompilerParams(
            dimension_semantics=("parallel",),
            vmem_limit_bytes=32 * 1024 * 1024),
    )(x, kparams["w1"], kparams["s1"], kparams["sh1"],
      kparams["w2"], s2, sh2, kparams["wp"], kparams["bp"])

    return out.reshape(Bp, 128)[:B]                 # (B, 128)


def audio_encoder_ref(audio_features, params):
    """Pure-JAX (XLA, f32) reference with identical eval-mode semantics."""
    hi = jax.lax.Precision.HIGHEST
    x = jnp.squeeze(audio_features, axis=1).astype(jnp.float32)
    x = jnp.transpose(x, (0, 2, 1))                 # (B, L, 64)
    B, L, _ = x.shape
    L1, Lp = L - 2, (L - 2) // 2
    L2 = Lp - 2
    xcat = jnp.concatenate([x[:, k:k + L1, :] for k in range(3)], axis=-1)
    y1 = jax.nn.relu(jnp.einsum('blc,cd->bld', xcat, params["w1_fused"], precision=hi)
                     * params["bn1_scale"] + params["bn1_shift"])
    y1p = jnp.maximum(y1[:, 0:2 * Lp:2, :], y1[:, 1:2 * Lp:2, :])
    xcat2 = jnp.concatenate([y1p[:, k:k + L2, :] for k in range(3)], axis=-1)
    y2 = jax.nn.relu(jnp.einsum('blc,cd->bld', xcat2, params["w2_fused"], precision=hi)
                     * params["bn2_scale"] + params["bn2_shift"])
    feat = jnp.mean(y2, axis=1)                     # (B, 128)
    return jax.nn.relu(jnp.dot(feat, params["wp_t"], precision=hi) + params["bp"])


def init_params(key):
    """Logical (f32) parameters with eval-mode BatchNorm folded into scale/shift."""
    ks = jax.random.split(key, 14)
    eps = 1e-5

    w1 = 0.05 * jax.random.normal(ks[0], (64, 64, 3), jnp.float32)    # (out, in, k)
    b1 = 0.05 * jax.random.normal(ks[1], (64,), jnp.float32)
    g1 = 1.0 + 0.1 * jax.random.normal(ks[2], (64,), jnp.float32)
    be1 = 0.1 * jax.random.normal(ks[3], (64,), jnp.float32)
    rm1 = 0.1 * jax.random.normal(ks[4], (64,), jnp.float32)
    rv1 = 1.0 + 0.5 * jax.random.uniform(ks[5], (64,), jnp.float32)

    w2 = 0.05 * jax.random.normal(ks[6], (128, 64, 3), jnp.float32)   # (out, in, k)
    b2 = 0.05 * jax.random.normal(ks[7], (128,), jnp.float32)
    # TODO(synk): PyTorch declares BatchNorm1d(64) here but feeds 128 channels
    #             (runtime error in torch); 128-channel BN params are used instead.
    g2 = 1.0 + 0.1 * jax.random.normal(ks[8], (128,), jnp.float32)
    be2 = 0.1 * jax.random.normal(ks[9], (128,), jnp.float32)
    rm2 = 0.1 * jax.random.normal(ks[10], (128,), jnp.float32)
    rv2 = 1.0 + 0.5 * jax.random.uniform(ks[11], (128,), jnp.float32)

    wp = 0.05 * jax.random.normal(ks[12], (128, 128), jnp.float32)    # (out, in)
    bp = 0.05 * jax.random.normal(ks[13], (128,), jnp.float32)

    s1 = g1 / jnp.sqrt(rv1 + eps)
    sh1 = be1 + s1 * (b1 - rm1)
    s2 = g2 / jnp.sqrt(rv2 + eps)
    sh2 = be2 + s2 * (b2 - rm2)

    # Fused conv weights (K = 3*C_in): row index = k*C_in + c_in.
    w1_fused = jnp.transpose(w1, (2, 1, 0)).reshape(3 * 64, 64)       # (192, 64)
    w2_fused = jnp.transpose(w2, (2, 1, 0)).reshape(3 * 64, 128)      # (192, 128)

    return dict(
        w1_fused=w1_fused,
        bn1_scale=s1.reshape(1, 64), bn1_shift=sh1.reshape(1, 64),
        w2_fused=w2_fused,
        bn2_scale=s2.reshape(1, 128), bn2_shift=sh2.reshape(1, 128),
        wp_t=wp.T, bp=bp.reshape(1, 128))


def pack_params(p):
    """Pad / fuse / cast the folded parameters into the kernel's MXU-friendly layout."""
    # conv1: K padded 192 -> 256 (zero 4th tap), output channels padded 64 -> 128.
    w1 = jnp.zeros((256, 128), jnp.float32).at[:192, :64].set(p["w1_fused"])
    # conv2: per-tap input channels padded 64 -> 128 (zero rows), K = 3*128 = 384.
    w2 = (jnp.zeros((3, 128, 128), jnp.float32)
          .at[:, :64, :].set(p["w2_fused"].reshape(3, 64, 128))
          .reshape(384, 128))
    s1 = jnp.zeros((1, 128), jnp.float32).at[:, :64].set(p["bn1_scale"])
    sh1 = jnp.zeros((1, 128), jnp.float32).at[:, :64].set(p["bn1_shift"])
    return dict(w1=w1.astype(jnp.bfloat16), s1=s1, sh1=sh1,
                w2=w2.astype(jnp.bfloat16), s2=p["bn2_scale"], sh2=p["bn2_shift"],
                wp=p["wp_t"].astype(jnp.bfloat16), bp=p["bp"])


if __name__ == "__main__":
    key = jax.random.PRNGKey(0)
    pkey, xkey = jax.random.split(key)
    params = init_params(pkey)
    kparams = pack_params(params)

    B, L = 2, 16   # (B, 1, 64, L); L=16 -> conv 14 -> pool 7 -> conv 5 -> avg 1
    audio_features = jax.random.normal(xkey, (B, 1, 64, L), jnp.float32)

    out = jax.block_until_ready(audio_encoder(audio_features, kparams))
    assert out.shape == (B, 128), out.shape
    assert bool(jnp.all(jnp.isfinite(out)))

    ref = audio_encoder_ref(audio_features, params)
    max_err = float(jnp.max(jnp.abs(out - ref)))
    assert max_err < 5e-2, f"mismatch vs f32 reference: {max_err}"
    print("KERNEL_OK")
</pallas_src>

<mosaic_0001>
module attributes {stable_mosaic.version = 11 : i64} {
  func.func @audio_encoder_kernel(%arg0: i32, %arg1: memref<1x16x64xf32, #tpu.memory_space<vmem>>, %arg2: memref<256x128xbf16, #tpu.memory_space<vmem>>, %arg3: memref<1x128xf32, #tpu.memory_space<vmem>>, %arg4: memref<1x128xf32, #tpu.memory_space<vmem>>, %arg5: memref<384x128xbf16, #tpu.memory_space<vmem>>, %arg6: memref<1x128xf32, #tpu.memory_space<vmem>>, %arg7: memref<1x128xf32, #tpu.memory_space<vmem>>, %arg8: memref<128x128xbf16, #tpu.memory_space<vmem>>, %arg9: memref<1x128xf32, #tpu.memory_space<vmem>>, %arg10: memref<1x1x128xf32, #tpu.memory_space<vmem>>, %arg11: memref<14x128xf32, #tpu.memory_space<vmem>>) attributes {dimension_semantics = [#tpu.dimension_semantics<parallel>], iteration_bounds = array<i64: 2>, scalar_prefetch = 0 : i64, scratch_operands = 1 : i64, tpu.core_type = #tpu.core_type<tc>, window_params = [{transform_indices = @transform_0, window_bounds = array<i64: 1, 16, 64>}, {pipeline_mode = #tpu.pipeline_mode<synchronous>, transform_indices = @transform_1, window_bounds = array<i64: 256, 128>}, {pipeline_mode = #tpu.pipeline_mode<synchronous>, transform_indices = @transform_2, window_bounds = array<i64: 1, 128>}, {pipeline_mode = #tpu.pipeline_mode<synchronous>, transform_indices = @transform_3, window_bounds = array<i64: 1, 128>}, {pipeline_mode = #tpu.pipeline_mode<synchronous>, transform_indices = @transform_4, window_bounds = array<i64: 384, 128>}, {pipeline_mode = #tpu.pipeline_mode<synchronous>, transform_indices = @transform_5, window_bounds = array<i64: 1, 128>}, {pipeline_mode = #tpu.pipeline_mode<synchronous>, transform_indices = @transform_6, window_bounds = array<i64: 1, 128>}, {pipeline_mode = #tpu.pipeline_mode<synchronous>, transform_indices = @transform_7, window_bounds = array<i64: 128, 128>}, {pipeline_mode = #tpu.pipeline_mode<synchronous>, transform_indices = @transform_8, window_bounds = array<i64: 1, 128>}, {transform_indices = @transform_9, window_bounds = array<i64: 1, 1, 128>}]} {
    %c0 = arith.constant 0 : index
    %c0_0 = arith.constant 0 : index
    %c0_1 = arith.constant 0 : index
    %0 = vector.load %arg1[%c0, %c0_0, %c0_1] : memref<1x16x64xf32, #tpu.memory_space<vmem>>, vector<1x14x64xf32>
    %c0_2 = arith.constant 0 : index
    %c1 = arith.constant 1 : index
    %c0_3 = arith.constant 0 : index
    %1 = vector.load %arg1[%c0_2, %c1, %c0_3] : memref<1x16x64xf32, #tpu.memory_space<vmem>>, vector<1x14x64xf32>
    %c0_4 = arith.constant 0 : index
    %c2 = arith.constant 2 : index
    %c0_5 = arith.constant 0 : index
    %2 = vector.load %arg1[%c0_4, %c2, %c0_5] : memref<1x16x64xf32, #tpu.memory_space<vmem>>, vector<1x14x64xf32>
    %cst = arith.constant 0.000000e+00 : f32
    %3 = vector.broadcast %cst : f32 to vector<1x14x64xf32>
    %4 = tpu.concatenate %0, %1, %2, %3 in 2 : vector<1x14x64xf32>, vector<1x14x64xf32>, vector<1x14x64xf32>, vector<1x14x64xf32> -> vector<1x14x256xf32>
    %5 = vector.shape_cast %4 : vector<1x14x256xf32> to vector<14x256xf32>
    %6 = arith.truncf %5 : vector<14x256xf32> to vector<14x256xbf16>
    %c0_6 = arith.constant 0 : index
    %c0_7 = arith.constant 0 : index
    %7 = vector.load %arg2[%c0_6, %c0_7] : memref<256x128xbf16, #tpu.memory_space<vmem>>, vector<256x128xbf16>
    %cst_8 = arith.constant dense<0.000000e+00> : vector<14x128xf32>
    %8 = tpu.matmul %6, %7, %cst_8 {dimension_numbers = #tpu.dot_dimension_numbers<[1], [0], [0], [1], [0, 0, 1, 1], [], []>} : vector<14x256xbf16>, vector<256x128xbf16>, vector<14x128xf32> -> vector<14x128xf32>
    %c0_9 = arith.constant 0 : index
    %c0_10 = arith.constant 0 : index
    %9 = vector.load %arg3[%c0_9, %c0_10] : memref<1x128xf32, #tpu.memory_space<vmem>>, vector<1x128xf32>
    %10 = vector.broadcast %9 : vector<1x128xf32> to vector<14x128xf32>
    %11 = arith.mulf %8, %10 : vector<14x128xf32>
    %c0_11 = arith.constant 0 : index
    %c0_12 = arith.constant 0 : index
    %12 = vector.load %arg4[%c0_11, %c0_12] : memref<1x128xf32, #tpu.memory_space<vmem>>, vector<1x128xf32>
    %13 = vector.broadcast %12 : vector<1x128xf32> to vector<14x128xf32>
    %14 = arith.addf %11, %13 : vector<14x128xf32>
    %cst_13 = arith.constant 0.000000e+00 : f32
    %15 = vector.broadcast %cst_13 : f32 to vector<14x128xf32>
    %16 = arith.maximumf %14, %15 : vector<14x128xf32>
    %c0_14 = arith.constant 0 : index
    %c0_15 = arith.constant 0 : index
    %17 = vector.load %arg11[%c0_14, %c0_15] : memref<14x128xf32, #tpu.memory_space<vmem>>, vector<14x128xf32>
    tpu.vector_store %arg11[%c0_14, %c0_15], %16 {strides = array<i32>} : memref<14x128xf32, #tpu.memory_space<vmem>>, vector<14x128xf32>,
    %c0_16 = arith.constant 0 : index
    %c0_17 = arith.constant 0 : index
    %18 = tpu.strided_load %arg11[%c0_16, %c0_17] {strides = array<i32: 2, 1>} : memref<14x128xf32, #tpu.memory_space<vmem>>, vector<7x128xf32>
    %c1_18 = arith.constant 1 : index
    %c0_19 = arith.constant 0 : index
    %19 = tpu.strided_load %arg11[%c1_18, %c0_19] {strides = array<i32: 2, 1>} : memref<14x128xf32, #tpu.memory_space<vmem>>, vector<7x128xf32>
    %20 = arith.maximumf %18, %19 : vector<7x128xf32>
    %21 = vector.shape_cast %20 : vector<7x128xf32> to vector<1x7x128xf32>
    %22 = vector.extract_strided_slice %21 {offsets = [0, 0, 0], sizes = [1, 5, 128], strides = [1, 1, 1]} : vector<1x7x128xf32> to vector<1x5x128xf32>
    %23 = vector.extract_strided_slice %21 {offsets = [0, 1, 0], sizes = [1, 5, 128], strides = [1, 1, 1]} : vector<1x7x128xf32> to vector<1x5x128xf32>
    %24 = vector.extract_strided_slice %21 {offsets = [0, 2, 0], sizes = [1, 5, 128], strides = [1, 1, 1]} : vector<1x7x128xf32> to vector<1x5x128xf32>
    %25 = tpu.concatenate %22, %23, %24 in 2 : vector<1x5x128xf32>, vector<1x5x128xf32>, vector<1x5x128xf32> -> vector<1x5x384xf32>
    %26 = vector.shape_cast %25 : vector<1x5x384xf32> to vector<5x384xf32>
    %27 = arith.truncf %26 : vector<5x384xf32> to vector<5x384xbf16>
    %c0_20 = arith.constant 0 : index
    %c0_21 = arith.constant 0 : index
    %28 = vector.load %arg5[%c0_20, %c0_21] : memref<384x128xbf16, #tpu.memory_space<vmem>>, vector<384x128xbf16>
    %cst_22 = arith.constant dense<0.000000e+00> : vector<5x128xf32>
    %29 = tpu.matmul %27, %28, %cst_22 {dimension_numbers = #tpu.dot_dimension_numbers<[1], [0], [0], [1], [0, 0, 1, 1], [], []>} : vector<5x384xbf16>, vector<384x128xbf16>, vector<5x128xf32> -> vector<5x128xf32>
    %c0_23 = arith.constant 0 : index
    %c0_24 = arith.constant 0 : index
    %30 = vector.load %arg6[%c0_23, %c0_24] : memref<1x128xf32, #tpu.memory_space<vmem>>, vector<1x128xf32>
    %31 = vector.broadcast %30 : vector<1x128xf32> to vector<5x128xf32>
    %32 = arith.mulf %29, %31 : vector<5x128xf32>
    %c0_25 = arith.constant 0 : index
    %c0_26 = arith.constant 0 : index
    %33 = vector.load %arg7[%c0_25, %c0_26] : memref<1x128xf32, #tpu.memory_space<vmem>>, vector<1x128xf32>
    %34 = vector.broadcast %33 : vector<1x128xf32> to vector<5x128xf32>
    %35 = arith.addf %32, %34 : vector<5x128xf32>
    %cst_27 = arith.constant 0.000000e+00 : f32
    %36 = vector.broadcast %cst_27 : f32 to vector<5x128xf32>
    %37 = arith.maximumf %35, %36 : vector<5x128xf32>
    %38 = vector.shape_cast %37 : vector<5x128xf32> to vector<1x5x128xf32>
    %cst_28 = arith.constant dense<0.000000e+00> : vector<1x128xf32>
    %39 = vector.multi_reduction <add>, %38, %cst_28 [1] : vector<1x5x128xf32> to vector<1x128xf32>
    %40 = arith.truncf %39 : vector<1x128xf32> to vector<1x128xbf16>
    %c0_29 = arith.constant 0 : index
    %c0_30 = arith.constant 0 : index
    %41 = vector.load %arg8[%c0_29, %c0_30] : memref<128x128xbf16, #tpu.memory_space<vmem>>, vector<128x128xbf16>
    %cst_31 = arith.constant dense<0.000000e+00> : vector<1x128xf32>
    %42 = tpu.matmul %40, %41, %cst_31 {dimension_numbers = #tpu.dot_dimension_numbers<[1], [0], [0], [1], [0, 0, 1, 1], [], []>} : vector<1x128xbf16>, vector<128x128xbf16>, vector<1x128xf32> -> vector<1x128xf32>
    %c0_32 = arith.constant 0 : index
    %c0_33 = arith.constant 0 : index
    %43 = vector.load %arg9[%c0_32, %c0_33] : memref<1x128xf32, #tpu.memory_space<vmem>>, vector<1x128xf32>
    %44 = arith.addf %42, %43 : vector<1x128xf32>
    %cst_34 = arith.constant 0.000000e+00 : f32
    %45 = vector.broadcast %cst_34 : f32 to vector<1x128xf32>
    %46 = arith.maximumf %44, %45 : vector<1x128xf32>
    %47 = vector.shape_cast %46 : vector<1x128xf32> to vector<1x1x128xf32>
    %c0_35 = arith.constant 0 : index
    %c0_36 = arith.constant 0 : index
    %c0_37 = arith.constant 0 : index
    %48 = vector.load %arg10[%c0_35, %c0_36, %c0_37] : memref<1x1x128xf32, #tpu.memory_space<vmem>>, vector<1x1x128xf32>
    tpu.vector_store %arg10[%c0_35, %c0_36, %c0_37], %47 {strides = array<i32>} : memref<1x1x128xf32, #tpu.memory_space<vmem>>, vector<1x1x128xf32>,
    return
  }
  func.func @transform_0(%arg0: i32) -> (i32, i32, i32) {
    %c0_i32 = arith.constant 0 : i32
    %c0_i32_0 = arith.constant 0 : i32
    %c0_i32_1 = arith.constant 0 : i32
    return %arg0, %c0_i32, %c0_i32_0 : i32, i32, i32
  }
  func.func @transform_1(%arg0: i32) -> (i32, i32) {
    %c0_i32 = arith.constant 0 : i32
    %c0_i32_0 = arith.constant 0 : i32
    %c0_i32_1 = arith.constant 0 : i32
    return %c0_i32, %c0_i32_0 : i32, i32
  }
  func.func @transform_2(%arg0: i32) -> (i32, i32) {
    %c0_i32 = arith.constant 0 : i32
    %c0_i32_0 = arith.constant 0 : i32
    %c0_i32_1 = arith.constant 0 : i32
    return %c0_i32, %c0_i32_0 : i32, i32
  }
  func.func @transform_3(%arg0: i32) -> (i32, i32) {
    %c0_i32 = arith.constant 0 : i32
    %c0_i32_0 = arith.constant 0 : i32
    %c0_i32_1 = arith.constant 0 : i32
    return %c0_i32, %c0_i32_0 : i32, i32
  }
  func.func @transform_4(%arg0: i32) -> (i32, i32) {
    %c0_i32 = arith.constant 0 : i32
    %c0_i32_0 = arith.constant 0 : i32
    %c0_i32_1 = arith.constant 0 : i32
    return %c0_i32, %c0_i32_0 : i32, i32
  }
  func.func @transform_5(%arg0: i32) -> (i32, i32) {
    %c0_i32 = arith.constant 0 : i32
    %c0_i32_0 = arith.constant 0 : i32
    %c0_i32_1 = arith.constant 0 : i32
    return %c0_i32, %c0_i32_0 : i32, i32
  }
  func.func @transform_6(%arg0: i32) -> (i32, i32) {
    %c0_i32 = arith.constant 0 : i32
    %c0_i32_0 = arith.constant 0 : i32
    %c0_i32_1 = arith.constant 0 : i32
    return %c0_i32, %c0_i32_0 : i32, i32
  }
  func.func @transform_7(%arg0: i32) -> (i32, i32) {
    %c0_i32 = arith.constant 0 : i32
    %c0_i32_0 = arith.constant 0 : i32
    %c0_i32_1 = arith.constant 0 : i32
    return %c0_i32, %c0_i32_0 : i32, i32
  }
  func.func @transform_8(%arg0: i32) -> (i32, i32) {
    %c0_i32 = arith.constant 0 : i32
    %c0_i32_0 = arith.constant 0 : i32
    %c0_i32_1 = arith.constant 0 : i32
    return %c0_i32, %c0_i32_0 : i32, i32
  }
  func.func @transform_9(%arg0: i32) -> (i32, i32, i32) {
    %c0_i32 = arith.constant 0 : i32
    %c0_i32_0 = arith.constant 0 : i32
    %c0_i32_1 = arith.constant 0 : i32
    return %arg0, %c0_i32, %c0_i32_0 : i32, i32, i32
  }
}

</mosaic_0001>

<bundles_post_ra>
// kernel: tpu_custom_call.1
= control target key start
LH: loop header
LB: loop body
LE: loop exit
PB: predicated region body
PF: predicated region fallthrough
CT: control target
= control target key end

     0   :  { %s1932_s0 = inlined_call_operand.hbm [shape: f32[2,16,64], index: 0, kind: input, shape index: {}]   ;;  %s1933_s1 = inlined_call_operand.hbm [shape: bf16[256,128], index: 1, kind: input, shape index: {}]   ;;  %s1934_s2 = inlined_call_operand.vmem [shape: f32[1,128], index: 2, kind: input, shape index: {}]   ;;  %s1935_s3 = inlined_call_operand.vmem [shape: f32[1,128], index: 3, kind: input, shape index: {}]   ;;  %s1936_s4 = inlined_call_operand.hbm [shape: bf16[384,128], index: 4, kind: input, shape index: {}]   ;;  %s1937_s5 = inlined_call_operand.vmem [shape: f32[1,128], index: 5, kind: input, shape index: {}]   ;;  %s1938_s6 = inlined_call_operand.vmem [shape: f32[1,128], index: 6, kind: input, shape index: {}]   ;;  %s1939_s7 = inlined_call_operand.hbm [shape: bf16[128,128], index: 7, kind: input, shape index: {}]   ;;  %s1940_s8 = inlined_call_operand.vmem [shape: f32[1,128], index: 8, kind: input, shape index: {}]   ;;  %s1941_s9 = inlined_call_operand.hbm [shape: f32[2,1,128], index: 9, kind: output, shape index: {}]  }
   0x1   :  { %1946 = sst [smem:[#allocation16_spill]] %s1933_s1 }
   0x2   :  { %1947 = sst [smem:[#allocation17_spill]] %s1936_s4 }
   0x3   :  { %1948 = sst [smem:[#allocation18_spill]] %s1939_s7 }
   0x4   :  { %14 = vsyncpa [#allocation4], 0 }
   0x5   :  { %16 = vsyncpa [#allocation4 + $0x1], 0 }
   0x6   :  { %17 = vsyncpa [#allocation7], 0 }
   0x7   :  { %18 = vsyncpa [#allocation10], 0 }
   0x8   :  { %19 = vsyncpa [#allocation5], 0 }
   0x9   :  { %21 = vsyncpa [#allocation5 + $0x1], 0  ;;  %s1686_s30 = smov 0   ;;  %s1688_s10 = smov 0  }
   0xa   :  { %s1690_s11 = smov 0   ;;  %s1692_s12 = smov 0  }
   0xb LB: > { %s1707_s13 = sadd.s32 4294967295, %s1622_s12   ;;  %s1132_s14 = sadd.s32 4294967294, %s1622_s12   ;;  %s1622_s12 = sphi %s1692_s12, %s1971_s12   ;;  %s1618_s11 = sphi %s1690_s11, %s1970_s11   ;;  %s1614_s10 = sphi %s1688_s10, %s1969_s10   ;;  %s1610_s30 = sphi %s1686_s30, %s1968_s30  }
   0xc   : > { %p47_p0 = scmp.ne.s32.totalorder %s1614_s10, %s1610_s30  ;;  %p1942_p1 = scmp.eq.s32.totalorder %s1707_s13, 0 }
   0xd   : > { %p245_p3 = scmp.eq.s32.totalorder %s1132_s14, 1  ;;  %p1133_p5 = scmp.ge.s32.totalorder %s1622_s12, 1 }
   0xe   : > { %p1716_p4 = por %p1942_p1, %p47_p0  ;;  %p252_p7 = scmp.lt.s32.totalorder %s1622_s12, 3 }
   0xf   : > { %p1721_p6 = por %p245_p3, %p47_p0  ;;  %s1624_s18 = smov [#allocation6]  }
  0x10   : > { %s1949_s15 = scalar_select %p1716_p4, 1, 0 }
  0x11   : > { %s1950_s16 = scalar_select %p1721_p6, 1, 0 }
  0x12   : > { %p1726_p8 = pnand %p1133_p5, %p252_p7  ;;  %s264_s19 = sshll.u32 %s1624_s18, 4  ;;  %s265_s19 = int_to_ptr.vmem [resolvable:$true] %s264_s19 }
  0x13   : > { %s1625_s21 = smov [#allocation8]   ;;  %s1626_s23 = smov [#allocation9]  }
  0x14   : > { %s1951_s17 = scalar_select %p1726_p8, 1, 0 }
  0x15   : > { %p1323_p9 = pneg %p1726_p8  ;;  %s283_s22 = sshll.u32 %s1625_s21, 4  ;;  %s284_s22 = int_to_ptr.vmem [resolvable:$true] %s283_s22 }
  0x16   : > { %s302_s24 = sshll.u32 %s1626_s23, 4  ;;  %s1455_s25 = scalar_lea.vmem %s265_s19, 2048  ;;  %s303_s24 = int_to_ptr.vmem [resolvable:$true] %s302_s24 }
  0x17   : > { %p1735_p11 = pnand %p1323_p9, %p1942_p1  ;;  %p1456_p13 = scmp.ne.s32.totalorder %s265_s19, %s1455_s25 }
  0x18   : > { %p1463_p5 = scmp.lt.s32.totalorder %s265_s19, %s265_s19  ;;  %p1464_p7 = scmp.lt.s32.totalorder %s1455_s25, %s1455_s25 }
  0x19   : > { %p1446_p12 = pneg %p1735_p11 }
  0x1a   : > { %p1465_p9 = por %p1464_p7, %p1463_p5 }
  0x1b   : > { %p1458_p0 = pnand %p1456_p13, %p1446_p12 }
  0x1d   : > { %p1459_p3 = pneg %p1458_p0 }
  0x1f   : > { %p1466_p10 = pnand %p1465_p9, %p1459_p3 }
  0x21   : > { %1469 = shalt.err (!%p1466_p10)
}
  0x22   : > { %s1627_s26 = smov 64   ;;  %s1628_s27 = smov 4  }
  0x23   : > { %s1953_s1 = sld [smem:[#allocation16_spill]]  ;;  %s1481_s14 = scalar_lea.vmem %s284_s22, 3072 }
  0x24   : > { %p1482_p1 = scmp.ne.s32.totalorder %s284_s22, %s1481_s14  ;;  %p1489_p2 = scmp.lt.s32.totalorder %s284_s22, %s284_s22 }
  0x25   : > { %p1490_p6 = scmp.lt.s32.totalorder %s1481_s14, %s1481_s14 }
  0x26   : > { %p1484_p13 = pnand %p1482_p1, %p1446_p12 }
  0x27   : > { %p1491_p5 = por %p1490_p6, %p1489_p2 }
  0x28   : > { %p1485_p0 = pneg %p1484_p13 }
  0x29   : > { %1326 = dma.hbm_to_vmem [thread:$0]  (!%p1735_p11), %s1953_s1, 2048, %s265_s19, [#allocation7], %s1627_s26, %s1627_s26, %s1628_s27  }
  0x2a   : > { %p1492_p3 = pnand %p1491_p5, %p1485_p0 }
  0x2c   : > { %1495 = shalt.err (!%p1492_p3)
}
  0x2d   : > { %s1954_s4 = sld [smem:[#allocation17_spill]]  ;;  %s1507_s19 = scalar_lea.vmem %s303_s24, 1024 }
  0x2e   : > { %p1508_p10 = scmp.ne.s32.totalorder %s303_s24, %s1507_s19  ;;  %p1515_p9 = scmp.lt.s32.totalorder %s303_s24, %s303_s24 }
  0x2f   : > { %p1516_p13 = scmp.lt.s32.totalorder %s1507_s19, %s1507_s19 }
  0x30   : > { %p1510_p7 = pnand %p1508_p10, %p1446_p12 }
  0x31   : > { %p1517_p4 = por %p1516_p13, %p1515_p9 }
  0x32   : > { %p1511_p1 = pneg %p1510_p7 }
  0x33   : > { %1329 = dma.hbm_to_vmem [thread:$0]  (!%p1735_p11), %s1954_s4, 3072, %s284_s22, [#allocation7], %s1627_s26, %s1627_s26, %s1628_s27  }
  0x34   : > { %p1518_p2 = pnand %p1517_p4, %p1511_p1 }
  0x36   : > { %1521 = shalt.err (!%p1518_p2)
}
  0x37   : > { %s1955_s7 = sld [smem:[#allocation18_spill]]  ;;  %s1766_s22 = sadd.s32 1, %s1622_s12  }
  0x38   : > { %s31_s28 = ssub.s32 %s1622_s12, %s1766_s22  ;;  %s34_s20 = sadd.s32 1, %s1618_s11 }
  0x39   : > { %p32_p4 = scmp.eq.s32.totalorder %s31_s28, 0  ;;  %p41_p6 = scmp.ne.s32.totalorder %s1618_s11, %s1614_s10 }
  0x3a   : > { %p42_p12 = scmp.eq.s32.totalorder %s1622_s12, 0  ;;  %p1344_p0 = scmp.lt.s32.totalorder %s1622_s12, 2 }
  0x3b   : > { %s1776_s29 = scalar_select %p32_p4, %s1618_s11, %s34_s20  }
  0x3c   : > { %p43_p5 = por %p42_p12, %p41_p6  ;;  %p1956_p3 = scmp.eq.s32.totalorder %s1707_s13, 1 }
  0x3d   : > { %1332 = dma.hbm_to_vmem [thread:$0]  (!%p1735_p11), %s1955_s7, 1024, %s303_s24, [#allocation10], %s1627_s26, %s1627_s26, %s1628_s27  }
  0x3e   : > { %p1780_p10 = por %p1956_p3, %p41_p6  ;;  %s319_s18 = sand.u32 1, %s1618_s11  }
  0x3f   : > { %s1204_s21 = sshll.u32 %s1622_s12, 8  ;;  %s1138_s24 = sshll.u32 %s319_s18, 4 }
  0x40   : > { %s1957_s14 = scalar_select %p1780_p10, 1, 0 }
  0x41   : > { %s1789_s19 = scalar_lea.hbm %s1932_s0, %s1204_s21  ;;  %s323_s23 = scalar_lea.vmem [#allocation3], %s1138_s24 }
  0x42   : > { %s330_s25 = sshll.u32 %s323_s23, 4  ;;  %p1791_p11 = pnand %p1344_p0, %p43_p5  ;;  %s1795_s25 = int_to_ptr.vmem [resolvable:$true] %s330_s25 }
  0x43   : > { %s1797_s20 = scalar_lea.sflag [#allocation4], %s319_s18  ;;  %s1522_s1 = scalar_lea.hbm %s1789_s19, 256 }
  0x44   : > { %p1523_p7 = scmp.ne.s32.totalorder %s1789_s19, %s1522_s1  ;;  %p1524_p1 = pneg %p1791_p11 }
  0x45   : > { %s1527_s24 = scalar_lea.hbm %s1932_s0, 512  ;;  %p1528_p2 = scmp.lt.s32.totalorder %s1789_s19, %s1932_s0 }
  0x46   : > { %p1525_p9 = pnand %p1524_p1, %p1523_p7  ;;  %p1529_p4 = scmp.lt.s32.totalorder %s1527_s24, %s1522_s1 }
  0x48   : > { %p1526_p13 = pneg %p1525_p9  ;;  %p1530_p6 = por %p1529_p4, %p1528_p2 }
  0x4a   : > { %p1531_p12 = pnand %p1530_p6, %p1526_p13 }
  0x4c   : > { %1534 = shalt.err (!%p1531_p12)
}
  0x4d   : > { %s1535_s18 = scalar_lea.vmem %s1795_s25, 256  ;;  %s1629_s4 = smov [#allocation3]  }
  0x4e   : > { %p1536_p0 = scmp.ne.s32.totalorder %s1795_s25, %s1535_s18  ;;  %s1540_s7 = sshll.u32 %s1629_s4, 4  ;;  %s1541_s7 = int_to_ptr.vmem [resolvable:$false] %s1540_s7 }
  0x4f   : > { %s1542_s21 = scalar_lea.vmem %s1541_s7, 512  ;;  %p1543_p7 = scmp.lt.s32.totalorder %s1795_s25, %s1541_s7 }
  0x50   : > { %p1538_p5 = pnand %p1536_p0, %p1524_p1  ;;  %p1544_p9 = scmp.lt.s32.totalorder %s1542_s21, %s1535_s18 }
  0x52   : > { %p1539_p3 = pneg %p1538_p5  ;;  %p1545_p10 = por %p1544_p9, %p1543_p7 }
  0x54   : > { %p1546_p8 = pnand %p1545_p10, %p1539_p3 }
  0x56   : > { %1549 = shalt.err (!%p1546_p8)
}
  0x57   : > { %s1630_s1 = smov 128   ;;  %s1631_s26 = smov 8  }
  0x58   : > { %1336 = dma.hbm_to_vmem [thread:$0]  (!%p1791_p11), %s1789_s19, 256, %s1795_s25, %s1797_s20, %s1630_s1, %s1630_s1, %s1631_s26  }
  0x59   : > { %p1959_p1 = scmp.ne.s32.totalorder %s1951_s17, 0 }
  0x5a   : > { %s1821_s4 = sand.u32 (!%p1959_p1), 1, %s1614_s10   ;;  %p1960_p8 = scmp.ne.s32.totalorder (!%p1959_p1), %s1949_s15, 0 }
  0x5b   : > { %342 = sbr.rel (%p1959_p1) target bundleno = 879 (0x36f), region = 56  ;;  %s1142_s7 = sshll.u32 (!%p1959_p1), %s1821_s4, 4 }
  0x5c   : > { %s345_s24 = scalar_lea.sflag (!%p1959_p1), [#allocation4], %s1821_s4  ;;  %s1825_s27 = scalar_lea.vmem (!%p1959_p1), [#allocation3], %s1142_s7 }
  0x60   : > { %1593 = dma.done.wait (%p1960_p8), %s345_s24, 256  }
  0x61   : > { %1595 = vsyncadd (%p1960_p8), %s345_s24, 4294967040  ;;  %p1961_p10 = scmp.eq.s32.totalorder %s1707_s13, 0 }
  0x63   : > { %1597 = dma.done.wait (%p1961_p10), [#allocation7], 5120   ;;  %p1962_p11 = pmov %p1961_p10 }
  0x64   : > { %p1963_p13 = pmov %p1961_p10 }
  0x65   : > { %1599 = vsyncadd (%p1962_p11), [#allocation7], 4294962176 }
  0x66   : > { %1601 = dma.done.wait (%p1963_p13), [#allocation10], 1024   ;;  %p1964_p2 = pmov %p1961_p10 }
  0x67   : > { %v397_v0 = vld [vmem:[%s1825_s27 + $0x1] sm:$0xff]  ;;  %v398_v1 = vld [vmem:[%s1825_s27 + $0x9] sm:$0x3f]  ;;  %s1632_s15 = smov 64   ;;  %vm409_vm0 = vcmask 523264   ;;  %v1633_v24 = vmov 0.0  }
  0x68   : > { %1603 = vsyncadd (%p1964_p2), [#allocation10], 4294966272  ;;  %v1391_v2 = vpack.i.bf16 %v398_v1, %v397_v0  ;;  %v1396_v3 = vld [vmem:[#allocation6 + $0x78] sm:$0xff]   ;;  %v1398_v5 = vld [vmem:[#allocation6 + $0x70] sm:$0xff]   ;;  %vm1634_vm2 = vmmov 0   ;;  %vm908_vm3 = vcmask 1044480  }
  0x69   : > { %v1397_v4 = vld [vmem:[#allocation6 + $0x38] sm:$0xff]   ;;  %1205 = vmatprep.subr.bf16.mxu0 %v1396_v3  ;;  %v1399_v6 = vld [vmem:[#allocation6 + $0x30] sm:$0xff]   ;;  %v1400_v7 = vld [vmem:[#allocation6 + $0x68] sm:$0xff]   ;;  %s1201_s7 = sshll.u32 %s1707_s13, 4  ;;  %s393_s24 = scalar_lea.vmem [#allocation11], %s1821_s4 }
  0x6a   : > { %1392 = vrot.lane.b32.xlu0 %v1391_v2, %s1632_s15  ;;  %1206 = vmatpush3.bf16.msra.mxu0 %v1397_v4  ;;  %v1401_v8 = vld [vmem:[#allocation6 + $0x28] sm:$0xff]   ;;  %v1402_v9 = vld [vmem:[#allocation6 + $0x60] sm:$0xff]   ;;  %v1404_v11 = vld [vmem:[#allocation6 + $0x58] sm:$0xff]   ;;  %s1889_s19 = scalar_lea.hbm %s1941_s9, %s1201_s7  ;;  %s1025_s25 = scalar_lea.sflag [#allocation5], %s1821_s4 }
  0x6b   : > { %1207 = vmatprep.subr.bf16.mxu0 %v1398_v5  ;;  %v1403_v10 = vld [vmem:[#allocation6 + $0x20] sm:$0xff]   ;;  %v1405_v12 = vld [vmem:[#allocation6 + $0x18] sm:$0xff]   ;;  %v1406_v14 = vld [vmem:[#allocation6 + $0x50] sm:$0xff]   ;;  %p1965_p6 = scmp.ne.s32.totalorder %s1957_s14, 0  ;;  %s1635_s28 = smov [#allocation11]  }
  0x6c   : > { %v399_v13 = vld [vmem:[%s1825_s27 + $0x2] sm:$0xff]  ;;  %v400_v15 = vld [vmem:[%s1825_s27 + $0xa] sm:$0x3f]  ;;  %vm1162_vm1 = vmpackc.low %vm409_vm0, %vm409_vm0  ;;  %s1554_s20 = sshll.u32 %s1635_s28, 4  ;;  %s1555_s20 = int_to_ptr.vmem [resolvable:$false] %s1554_s20 }
  0x6d   : > { %v1407_v16 = vld [vmem:[#allocation6 + $0x10] sm:$0xff]   ;;  %v1163_v17 = vpack.c.bf16 %v400_v15, %v399_v13  ;;  %v1412_v18 = vld [vmem:[#allocation8 + $0x78] sm:$0xff]   ;;  %v1408_v19 = vld [vmem:[#allocation6 + $0x48] sm:$0xff]   ;;  %s1556_s23 = scalar_lea.vmem %s1555_s20, 32 }
  0x6e   : > { %1208 = vmatpush3.bf16.msra.mxu0 %v1399_v6  ;;  %v1414_v20 = vld [vmem:[#allocation8 + $0x38] sm:$0xff]   ;;  %1227 = vmatprep.subr.bf16.mxu1 %v1412_v18  ;;  %v1409_v21 = vld [vmem:[#allocation6 + $0x8] sm:$0xff]   ;;  %v1410_v22 = vld [vmem:[#allocation6 + $0x40] sm:$0xff]  }
  0x6f   : > { %1209 = vmatprep.subr.bf16.mxu0 %v1400_v7  ;;  %1164 = vmatprep.mubr.msk.bf16.mxu0 %vm1162_vm1, %v1163_v17  ;;  %v1411_v23 = vld [vmem:[#allocation6] sm:$0xff]   ;;  %v396_v27 = vld [vmem:[%s1825_s27 + $0x8] sm:$0x3f]  ;;  %v1415_v34 = vld [vmem:[#allocation8 + $0x70] sm:$0xff]  }
  0x70   : > { %1228 = vmatpush3.bf16.msra.mxu1 %v1414_v20  ;;  %v395_v26 = vld [vmem:[%s1825_s27] sm:$0xff]  ;;  %v1413_v32 = vld [vmem:[#allocation8 + $0xb8] sm:$0xff]   ;;  %v1418_v37 = vld [vmem:[#allocation8 + $0x68] sm:$0xff]   ;;  %s1037_s27 = sshll.u32 %s393_s24, 4  ;;  %s1891_s27 = int_to_ptr.vmem [resolvable:$true] %s1037_s27 }
  0x71   : > { %v1416_v35 = vld [vmem:[#allocation8 + $0xb0] sm:$0xff]   ;;  %1229 = vmatprep.subr.bf16.mxu1 %v1415_v34  ;;  %v1419_v38 = vld [vmem:[#allocation8 + $0xa8] sm:$0xff]   ;;  %v1421_v40 = vld [vmem:[#allocation8 + $0x60] sm:$0xff]   ;;  %s1550_s13 = scalar_lea.vmem %s1891_s27, 16  ;;  %p1557_p5 = scmp.lt.s32.totalorder %s1891_s27, %s1555_s20 }
  0x72   : > { %1210 = vmatpush3.bf16.msra.mxu0 %v1401_v8  ;;  %v1417_v36 = vld [vmem:[#allocation8 + $0x30] sm:$0xff]   ;;  %v1420_v39 = vld [vmem:[#allocation8 + $0x28] sm:$0xff]   ;;  %v1422_v41 = vld [vmem:[#allocation8 + $0xa0] sm:$0xff]   ;;  %p1551_p4 = scmp.ne.s32.totalorder %s1891_s27, %s1550_s13  ;;  %p1558_p3 = scmp.lt.s32.totalorder %s1556_s23, %s1550_s13 }
  0x73   : > { %1211 = vmatprep.subr.bf16.mxu0 %v1402_v9  ;;  %v1423_v42 = vld [vmem:[#allocation8 + $0x20] sm:$0xff]   ;;  %v1424_v43 = vld [vmem:[#allocation8 + $0x58] sm:$0xff]   ;;  %v1427_v46 = vld [vmem:[#allocation8 + $0x50] sm:$0xff]  }
  0x74   : > { %1230 = vmatpush3.bf16.msra.mxu1 %v1417_v36  ;;  %v1425_v44 = vld [vmem:[#allocation8 + $0x98] sm:$0xff]   ;;  %v1428_v47 = vld [vmem:[#allocation8 + $0x90] sm:$0xff]   ;;  %v1430_v49 = vld [vmem:[#allocation8 + $0x48] sm:$0xff]   ;;  %p1552_p12 = pnand %p1551_p4, %p1965_p6  ;;  %p1559_p7 = por %p1558_p3, %p1557_p5 }
  0x75   : > { %1231 = vmatprep.subr.bf16.mxu1 %v1418_v37  ;;  %v1426_v45 = vld [vmem:[#allocation8 + $0x18] sm:$0xff]   ;;  %v1429_v48 = vld [vmem:[#allocation8 + $0x10] sm:$0xff]   ;;  %v1431_v50 = vld [vmem:[#allocation8 + $0x88] sm:$0xff]  }
  0x76   : > { %1212 = vmatpush3.bf16.msra.mxu0 %v1403_v10  ;;  %v1432_v51 = vld [vmem:[#allocation8 + $0x8] sm:$0xff]   ;;  %v1433_v52 = vld [vmem:[#allocation8 + $0x40] sm:$0xff]   ;;  %v1165_v57 = vld [vmem:[%s1934_s2] ss:$0 sm:$0xff]  ;;  %p1553_p0 = pneg %p1552_p12 }
  0x77   : > { %1213 = vmatprep.subr.bf16.mxu0 %v1404_v11  ;;  %v1434_v53 = vld [vmem:[#allocation8 + $0x80] sm:$0xff]   ;;  %v1166_v59 = vld [vmem:[%s1935_s3] ss:$0 sm:$0xff]  ;;  %v1438_v15 = vld [vmem:[#allocation9 + $0x28] sm:$0xff]  }
  0x78   : > { %1232 = vmatpush3.bf16.msra.mxu1 %v1420_v39  ;;  %v1435_v54 = vld [vmem:[#allocation8] sm:$0xff]   ;;  %v1440_v17 = vld [vmem:[#allocation9 + $0x18] sm:$0xff]   ;;  %v1441_v18 = vld [vmem:[#allocation9 + $0x10] sm:$0xff]   ;;  %p1560_p9 = pnand %p1559_p7, %p1553_p0 }
  0x79   : > { %1233 = vmatprep.subr.bf16.mxu1 %v1421_v40  ;;  %v1443_v20 = vld [vmem:[#allocation9] sm:$0xff]  }
  0x7a   : > { %1214 = vmatpush3.bf16.msra.mxu0 %v1405_v12  ;;  %v1436_v12 = vld [vmem:[#allocation9 + $0x38] sm:$0xff]  }
  0x7b   : > { %1215 = vmatprep.subr.bf16.mxu0 %v1406_v14  ;;  %v1437_v14 = vld [vmem:[#allocation9 + $0x30] sm:$0xff]  }
  0x7c   : > { %1234 = vmatpush3.bf16.msra.mxu1 %v1423_v42 }
  0x7d   : > { %1235 = vmatprep.subr.bf16.mxu1 %v1424_v43 }
  0x7e   : > { %1216 = vmatpush3.bf16.msra.mxu0 %v1407_v16  ;;  %v1439_v16 = vld [vmem:[#allocation9 + $0x20] sm:$0xff]  }
  0x7f   : > { %1217 = vmatprep.subr.bf16.mxu0 %v1408_v19  ;;  %v1442_v19 = vld [vmem:[#allocation9 + $0x8] sm:$0xff]  }
  0x80   : > { %1236 = vmatpush3.bf16.msra.mxu1 %v1426_v45 }
  0x81   : > { %1237 = vmatprep.subr.bf16.mxu1 %v1427_v46 }
  0x82   : > { %1218 = vmatpush3.bf16.msra.mxu0 %v1409_v21 }
  0x83   : > { %1219 = vmatprep.subr.bf16.mxu0 %v1410_v22 }
  0x84   : > { %1238 = vmatpush3.bf16.msra.mxu1 %v1429_v48 }
  0x85   : > { %1239 = vmatprep.subr.bf16.mxu1 %v1430_v49 }
  0x86   : > { %1220 = vmatpush3.bf16.msra.mxu0 %v1411_v23 }
  0x87   : > { %1267 = vmatprep.subr.bf16.mxu0 %v1633_v24 }
  0x88   : > { %1240 = vmatpush3.bf16.msra.mxu1 %v1432_v51 }
  0x89   : > { %1241 = vmatprep.subr.bf16.mxu1 %v1433_v52 }
  0x8c   : > { %1242 = vmatpush3.bf16.msra.mxu1 %v1435_v54 }
  0x8d   : > { %1287 = vmatprep.subr.bf16.mxu1 %v1633_v24 }
  0xdc   : > { %v1393_v25 = vpop.permute.xlu0 %1392 }
  0xdd   : > { %v1395_v28 = vunpack.i.h.bf16 %v1393_v25  ;;  %v1394_v29 = vunpack.i.l.bf16 %v1393_v25 }
  0xdf   : > { %v410_v30 = vsel %vm409_vm0, %v395_v26, %v1394_v29  ;;  %v411_v31 = vsel %vm409_vm0, %v396_v27, %v1395_v28  ;;  %v1191_v28 = vld [vmem:[%s1937_s5] ss:$0 sm:$0xff] }
  0xe0   : > { %v414_v33 = vpack.c.bf16 %v411_v31, %v410_v30 }
  0xe2   : > { %577 = vmatmul.mubr.bf16.vlgmr.msra.gmra.mxu0 %v414_v33 }
  0xe3   : > { %1268 = vmatpush3.bf16.msra.mxu0 %v1413_v32  ;;  %1283 = vmatprep.mubr.msk.bf16.mxu0 %vm1634_vm2, %v1633_v24  ;;  %v1192_v32 = vld [vmem:[%s1938_s6] ss:$0 sm:$0xff] }
  0xe4   : > { %1269 = vmatprep.subr.bf16.mxu0 %v1633_v24 }
  0xe7   : > { %1270 = vmatpush3.bf16.msra.mxu0 %v1416_v35 }
  0xe8   : > { %1271 = vmatprep.subr.bf16.mxu0 %v1633_v24 }
  0xeb   : > { %1272 = vmatpush3.bf16.msra.mxu0 %v1419_v38 }
  0xec   : > { %1273 = vmatprep.subr.bf16.mxu0 %v1633_v24 }
  0xef   : > { %1274 = vmatpush3.bf16.msra.mxu0 %v1422_v41 }
  0xf0   : > { %1275 = vmatprep.subr.bf16.mxu0 %v1633_v24 }
  0xf3   : > { %1276 = vmatpush3.bf16.msra.mxu0 %v1425_v44  ;;  %v933_v44 = vld [vmem:[%s1940_s8] sm:$0x1] }
  0xf4   : > { %1277 = vmatprep.subr.bf16.mxu0 %v1633_v24 }
  0xf7   : > { %1278 = vmatpush3.bf16.msra.mxu0 %v1428_v47 }
  0xf8   : > { %1279 = vmatprep.subr.bf16.mxu0 %v1633_v24 }
  0xfb   : > { %1280 = vmatpush3.bf16.msra.mxu0 %v1431_v50 }
  0xfc   : > { %1281 = vmatprep.subr.bf16.mxu0 %v1633_v24 }
  0xff   : > { %1282 = vmatpush3.bf16.msra.mxu0 %v1434_v53 }
 0x1a2   : > { %v1221_v55 = vpop.f32.mrf.mxu0 }
 0x1a4   : > { %v1222_v56 = vpop.f32.mrf.mxu0 }
 0x1a5   : > { %v1223_v58 = vadd.f32 %v1222_v56, %v1221_v55 }
 0x1a6   : > { %v1224_v60 = vpop.f32.mrf.mxu0 }
 0x1a7   : > { %v592_v61 = vmul.f32 %v1223_v58, %v1165_v57 }
 0x1a8   : > { %v1225_v62 = vpop.f32.mrf.mxu0 }
 0x1a9   : > { %v601_v63 = vadd.f32 %v1166_v59, %v592_v61  ;;  %v1226_v0 = vadd.f32 %v1225_v62, %v1224_v60 }
 0x1ab   : > { %v603_v1 = vmax.f32 %v601_v63, 0.0  ;;  %v593_v2 = vmul.f32 %v1226_v0, %v1165_v57 }
 0x1ad   : > { %605 = vst [vmem:[#allocation2] sm:$0xff] %v603_v1  ;;  %v602_v3 = vadd.f32 %v1166_v59, %v593_v2 }
 0x1af   : > { %v604_v4 = vmax.f32 %v602_v3, 0.0 }
 0x1b1   : > { %606 = vst [vmem:[#allocation2 + $0x8] sm:$0x3f] %v604_v4 }
 0x1b8   : > { %v607_v5 = vld [vmem:[#allocation2] ss:$2 sm:$0x7f]  ;;  %v609_v6 = vld [vmem:[#allocation2 + $0x1] ss:$2 sm:$0x7f] }
 0x1b9   : > { %v610_v7 = vmax.f32 %v607_v5, %v609_v6 }
 0x1bb   : > { %v612_v8 = vrot.slane %v610_v7, 1  ;;  %v614_v9 = vrot.slane %v610_v7, 2  ;;  %v616_v13 = vpack.c.bf16 %v610_v7, %v610_v7 }
 0x1bd   : > { %v617_v10 = vpack.c.bf16 %v612_v8, %v612_v8  ;;  %v618_v11 = vpack.c.bf16 %v614_v9, %v614_v9 }
 0x1bf   : > { %843 = vmatprep.mubr.bf16.mxu1 %v617_v10  ;;  %1284 = vmatmul.mubr.bf16.vlgmr.msra.gmra.mxu0 %v618_v11 }
 0x1c0   : > { %844 = vmatmul.mubr.bf16.vlgmr.msra.gmra.mxu1 %v616_v13 }
 0x1c1   : > { %1288 = vmatpush3.bf16.msra.mxu1 %v1436_v12  ;;  %1303 = vmatprep.mubr.msk.bf16.mxu1 %vm1634_vm2, %v1633_v24 }
 0x1c2   : > { %1289 = vmatprep.subr.bf16.mxu1 %v1633_v24 }
 0x1c5   : > { %1290 = vmatpush3.bf16.msra.mxu1 %v1437_v14 }
 0x1c6   : > { %1291 = vmatprep.subr.bf16.mxu1 %v1633_v24 }
 0x1c9   : > { %1292 = vmatpush3.bf16.msra.mxu1 %v1438_v15 }
 0x1ca   : > { %1293 = vmatprep.subr.bf16.mxu1 %v1633_v24 }
 0x1cd   : > { %1294 = vmatpush3.bf16.msra.mxu1 %v1439_v16 }
 0x1ce   : > { %1295 = vmatprep.subr.bf16.mxu1 %v1633_v24 }
 0x1d1   : > { %1296 = vmatpush3.bf16.msra.mxu1 %v1440_v17 }
 0x1d2   : > { %1297 = vmatprep.subr.bf16.mxu1 %v1633_v24 }
 0x1d5   : > { %1298 = vmatpush3.bf16.msra.mxu1 %v1441_v18 }
 0x1d6   : > { %1299 = vmatprep.subr.bf16.mxu1 %v1633_v24 }
 0x1d9   : > { %1300 = vmatpush3.bf16.msra.mxu1 %v1442_v19 }
 0x1da   : > { %1301 = vmatprep.subr.bf16.mxu1 %v1633_v24 }
 0x1dd   : > { %1302 = vmatpush3.bf16.msra.mxu1 %v1443_v20 }
 0x27f   : > { %v885_v21 = vpop.f32.mrf.mxu0 }
 0x280   : > { %v1243_v22 = vpop.f32.mrf.mxu1 }
 0x281   : > { %v1285_v23 = vpop.f32.mrf.mxu0 }
 0x282   : > { %v1244_v25 = vpop.f32.mrf.mxu1 }
 0x283   : > { %v1245_v26 = vadd.f32 %v1244_v25, %v1243_v22  ;;  %v888_v27 = vpop.f32.mrf.mxu0 }
 0x284   : > { %v1246_v29 = vpop.f32.mrf.mxu1 }
 0x285   : > { %v886_v30 = vadd.f32 %v1245_v26, %v885_v21  ;;  %v1286_v31 = vpop.f32.mrf.mxu0 }
 0x286   : > { %v1247_v33 = vpop.f32.mrf.mxu1 }
 0x287   : > { %v898_v24 = vmul.f32 %v1191_v28, %v886_v30 }
 0x289   : > { %v906_v34 = vadd.f32 %v1192_v32, %v898_v24 }
 0x28b   : > { %v907_v35 = vmax.f32 %v906_v34, 0.0 }
 0x28d   : > { %v909_v36 = vsel %vm908_vm3, %v907_v35, 0.0 }
 0x28e   : > { %v910_v37 = vrot.slane %v909_v36, 4 }
 0x290   : > { %v911_v38 = vadd.f32 %v910_v37, %v909_v36 }
 0x292   : > { %v912_v39 = vrot.slane %v911_v38, 2 }
 0x294   : > { %v913_v40 = vadd.f32 %v912_v39, %v911_v38 }
 0x296   : > { %v914_v41 = vrot.slane %v913_v40, 1 }
 0x298   : > { %v915_v42 = vadd.f32 %v914_v41, %v913_v40 }
 0x29a   : > { %v916_v43 = vpack.c.bf16 %v915_v42, %v915_v42 }
 0x29c   : > { %1304 = vmatmul.mubr.bf16.vlgmr.msra.gmra.mxu1 %v916_v43 }
 0x35c   : > { %v1016_v45 = vpop.f32.mrf.mxu1 }
 0x35d   : > { %v1017_v46 = vadd.f32 %v1016_v45, %v933_v44 }
 0x35e   : > { %v1305_v47 = vpop.f32.mrf.mxu1 }
 0x35f   : > { %v1022_v48 = vmax.f32 %v1017_v46, 0.0 }
 0x360   : > { %v1019_v49 = vpop.f32.mrf.mxu1 }
 0x361   : > { %1023 = vst [vmem:[%s393_s24] sm:$0x1] %v1022_v48 }
 0x362   : > { %v1306_v50 = vpop.f32.mrf.mxu1 }
 0x363   : > { %1563 = shalt.err (!%p1560_p9)
}
 0x364   : > { %s1564_s18 = scalar_lea.hbm %s1889_s19, 16  ;;  %s1568_s1 = scalar_lea.hbm %s1941_s9, 32 }
 0x365   : > { %p1565_p1 = scmp.ne.s32.totalorder %s1889_s19, %s1564_s18  ;;  %p1569_p11 = scmp.lt.s32.totalorder %s1889_s19, %s1941_s9 }
 0x366   : > { %p1570_p13 = scmp.lt.s32.totalorder %s1568_s1, %s1564_s18 }
 0x367   : > { %p1566_p8 = pnand %p1565_p1, %p1965_p6 }
 0x368   : > { %p1571_p2 = por %p1570_p13, %p1569_p11 }
 0x369   : > { %p1567_p10 = pneg %p1566_p8 }
 0x36b   : > { %p1572_p4 = pnand %p1571_p2, %p1567_p10 }
 0x36d   : > { %1575 = shalt.err (!%p1572_p4)
}
 0x36e   : > { %1321 = dma.vmem_to_hbm [thread:$0]  (%p1965_p6), %s1891_s27, 16, %s1889_s19, %s1025_s25  }
 0x36f PF: > { %s1049_s24 = sand.u32 1, %s1610_s30   ;;  %p1966_p12 = scmp.ne.s32.totalorder %s1950_s16, 0 }
 0x370   : > { %p1967_p0 = scmp.ge.s32.totalorder %s1622_s12, 2  ;;  %s1050_s15 = scalar_lea.sflag [#allocation5], %s1049_s24 }
 0x372   : > { %p1338_p5 = pnand %p1967_p0, %p1966_p12 }
 0x374   : > { %p1339_p3 = pneg %p1338_p5 }
 0x376   : > { %1605 = dma.done.wait (%p1339_p3), %s1050_s15, 16  }
 0x377   : > { %1607 = vsyncadd (%p1339_p3), %s1050_s15, 4294967280  ;;  %p24_p7 = scmp.ge.s32.totalorder %s1766_s22, 4   ;;  %s1968_s30 = smov %s1614_s10 }
 0x378   : > { %s1969_s10 = smov %s1618_s11  ;;  %s1970_s11 = smov %s1776_s29 }
 0x379   : > { %s1971_s12 = smov %s1766_s22  ;;  %26 = sbr.rel (!%p24_p7) target bundleno = 11 (0xb), region = 114 }
 0x37e   :  { %1054 = vsyncpa [#allocation4], 1 }
 0x37f   :  { %1056 = vsyncpa [#allocation4 + $0x1], 1 }
 0x380   :  { %1057 = vsyncpa [#allocation7], 1 }
 0x381   :  { %1058 = vsyncpa [#allocation10], 1 }
 0x382   :  { %1059 = vsyncpa [#allocation5], 1 }
 0x383   :  { %1061 = vsyncpa [#allocation5 + $0x1], 1 }

</bundles_post_ra>
